<compile_context>
chip_gen: v7x
topology: tpu7x:2x2x1
jax: 0.10.0
libtpu: 0.0.40
codegen_flags: <defaults>
</compile_context>

<pallas_src>
import functools

import jax
import jax.numpy as jnp
from jax.experimental import pallas as pl
from jax.experimental.pallas import tpu as pltpu


def _round_up(x, m):
    return (x + m - 1) // m * m


def _vmem_limit_bytes(default=64 * 1024 * 1024):
    """Generation-aware VMEM limit: ~82% of physical VMEM (v5e/v6e: ~105 MiB, v7x: ~52 MiB)."""
    try:
        cap = int(pltpu.get_tpu_info().vmem_capacity_bytes)
        return max(16 * 1024 * 1024, int(cap * 0.82))
    except Exception:
        return default


# ---------------------------------------------------------------------------
# Pallas kernel: fused multi-layer SAGE forward.
# One grid step == one SAGEConv layer. The activation lives in o_ref (VMEM,
# constant block index -> resident across layers, written back to HBM once).
# ---------------------------------------------------------------------------
def fused_sage_kernel(x_ref, a_hbm_ref, inv_deg_ref, wcat_ref, b_ref,
                      o_ref, a_vmem, copy_sem, *, f_pad):
    layer = pl.program_id(0)
    num_layers = pl.num_programs(0)

    # Layer 0: kick off the one-time A DMA (HBM -> single-buffered VMEM scratch)
    # and seed the resident activation buffer with the (padded, bf16) input features.
    @pl.when(layer == 0)
    def _():
        pltpu.make_async_copy(a_hbm_ref, a_vmem, copy_sem).start()
        o_ref[...] = x_ref[...].astype(jnp.float32)

    xb = o_ref[...].astype(jnp.bfloat16)          # bf16 MXU inputs, f32 accumulation

    # Fused projection: [X @ W_l | X @ W_r] in one 2*F_pad-wide MXU matmul
    # (full 256-lane MXU width on v6e/v7x). Column slices land on 128-lane boundaries.
    hr = jnp.dot(xb, wcat_ref[...], preferred_element_type=jnp.float32)
    h_b = hr[:, :f_pad].astype(jnp.bfloat16)      # neighbor-projected features

    # Self/root term + bias written in place (reduces live f32 temporaries).
    o_ref[...] = hr[:, f_pad:] + b_ref[...]

    # Wait for A only now: the one-time A load is hidden behind the projection matmul.
    @pl.when(layer == 0)
    def _():
        pltpu.make_async_copy(a_hbm_ref, a_vmem, copy_sem).wait()

    # Mean aggregation: exact 0/1 adjacency on the MXU, exact f32 1/deg row scale after.
    agg = jnp.dot(a_vmem[...], h_b, preferred_element_type=jnp.float32)
    o_ref[...] += agg * inv_deg_ref[...]

    # relu on all but the last layer; dropout(p=0.5, training=False) == identity.
    # NOTE: padded (beyond-n) rows accumulate bias/relu across layers; A's padded
    # columns are zero so they never leak into real rows, and they are sliced off
    # in the wrapper.
    @pl.when(layer < num_layers - 1)
    def _():
        o_ref[...] = jnp.maximum(o_ref[...], 0.0)


# ---------------------------------------------------------------------------
# Glue: graph densification, parameter init, fused forward wrapper
# ---------------------------------------------------------------------------
def init_gnn_params(key, in_channels, hidden_channels, out_channels, num_layers):
    """Deterministic synthetic parameters for each SAGEConv layer: (W_l, W_r, b)."""
    dims = [in_channels] + [hidden_channels] * (num_layers - 1) + [out_channels]
    params = []
    for i in range(num_layers):
        f_in, f_out = dims[i], dims[i + 1]
        key, k1, k2 = jax.random.split(key, 3)
        wl = jax.random.normal(k1, (f_in, f_out), jnp.float32) * 0.1
        wr = jax.random.normal(k2, (f_in, f_out), jnp.float32) * 0.1
        b = jnp.zeros((1, f_out), jnp.float32)
        params.append((wl, wr, b))
    return params


def gnn_forward(x, edge_index, params):
    n, f_in = x.shape
    num_layers = len(params)
    f_out = params[-1][0].shape[1]

    feat_dims = [f_in] + [wl.shape[1] for (wl, _, _) in params]
    f_pad = _round_up(max(feat_dims), 128)   # lane-dense feature axis
    n_pad = _round_up(n, 128)                # MXU/lane-aligned node axis

    # Exact 0/1 (multi-)adjacency (duplicate edges counted, matching PyG mean over
    # messages); normalization factored out and applied in f32 after the MXU.
    src, dst = edge_index[0], edge_index[1]
    a01 = jnp.zeros((n, n), jnp.float32).at[dst, src].add(1.0)
    deg = a01.sum(axis=1, keepdims=True)
    inv_deg = jnp.zeros((n_pad, 1), jnp.float32).at[:n, :].set(
        1.0 / jnp.maximum(deg, 1.0))
    a01_pad = jnp.zeros((n_pad, n_pad), jnp.bfloat16).at[:n, :n].set(
        a01.astype(jnp.bfloat16))            # small integer counts: exact in bf16

    # Input features in bf16 (they are MXU inputs anyway) -> halves the one-time X DMA.
    x_pad = jnp.zeros((n_pad, f_pad), jnp.bfloat16).at[:n, :f_in].set(
        x.astype(jnp.bfloat16))

    # Concatenated per-layer weights [W_l | W_r] so the projection is one wide matmul.
    wcat_stack = jnp.zeros((num_layers, f_pad, 2 * f_pad), jnp.float32)
    b_stack = jnp.zeros((num_layers, 1, f_pad), jnp.float32)
    for i, (wl, wr, b) in enumerate(params):
        fi, fo = wl.shape
        wcat_stack = wcat_stack.at[i, :fi, :fo].set(wl)
        wcat_stack = wcat_stack.at[i, :fi, f_pad:f_pad + fo].set(wr)
        b_stack = b_stack.at[i, :, :fo].set(b)
    wcat_stack = wcat_stack.astype(jnp.bfloat16)

    flops = num_layers * (2 * n_pad * n_pad * f_pad          # aggregation
                          + 2 * n_pad * f_pad * (2 * f_pad)  # fused projection
                          + 2 * n_pad * f_pad)               # scale + add
    bytes_accessed = (a01_pad.size * 2 + x_pad.size * 2 + inv_deg.size * 4
                      + wcat_stack.size * 2 + b_stack.size * 4
                      + n_pad * f_pad * 4)

    kernel = functools.partial(fused_sage_kernel, f_pad=f_pad)

    out_pad = pl.pallas_call(
        kernel,
        out_shape=jax.ShapeDtypeStruct((n_pad, f_pad), jnp.float32),
        grid=(num_layers,),
        in_specs=[
            pl.BlockSpec((n_pad, f_pad), lambda l: (0, 0)),               # X (DMA'd once)
            pl.BlockSpec(memory_space=pl.ANY),                            # A01 in HBM
            pl.BlockSpec((n_pad, 1), lambda l: (0, 0)),                   # 1/deg (f32)
            pl.BlockSpec((None, f_pad, 2 * f_pad), lambda l: (l, 0, 0)),  # [W_l|W_r][layer]
            pl.BlockSpec((None, 1, f_pad), lambda l: (l, 0, 0)),          # b[layer]
        ],
        out_specs=pl.BlockSpec((n_pad, f_pad), lambda l: (0, 0)),         # resident activation
        scratch_shapes=[
            pltpu.VMEM((n_pad, n_pad), jnp.bfloat16),   # single-buffered resident A
            pltpu.SemaphoreType.DMA(()),                # completion sem for the A copy
        ],
        compiler_params=pltpu.CompilerParams(
            dimension_semantics=("arbitrary",),          # layers are sequential
            vmem_limit_bytes=_vmem_limit_bytes(),
        ),
        cost_estimate=pl.CostEstimate(
            flops=flops, transcendentals=0, bytes_accessed=bytes_accessed),
    )(x_pad, a01_pad, inv_deg, wcat_stack, b_stack)

    return out_pad[:n, :f_out]


def gnn_forward_reference(x, edge_index, params):
    """Pure-jnp reference with matching numerics (bf16 MXU inputs, f32 accumulation,
    exact f32 1/deg row scale applied after the aggregation matmul)."""
    n = x.shape[0]
    num_layers = len(params)
    src, dst = edge_index[0], edge_index[1]
    a01 = jnp.zeros((n, n), jnp.float32).at[dst, src].add(1.0)
    deg = a01.sum(axis=1, keepdims=True)
    inv_deg = 1.0 / jnp.maximum(deg, 1.0)
    a01_b = a01.astype(jnp.bfloat16)
    for i, (wl, wr, b) in enumerate(params):
        xb = x.astype(jnp.bfloat16)
        h = jnp.dot(xb, wl.astype(jnp.bfloat16), preferred_element_type=jnp.float32)
        r = jnp.dot(xb, wr.astype(jnp.bfloat16), preferred_element_type=jnp.float32) + b
        agg = jnp.dot(a01_b, h.astype(jnp.bfloat16),
                      preferred_element_type=jnp.float32) * inv_deg
        x = agg + r
        if i != num_layers - 1:
            x = jnp.maximum(x, 0.0)
    return x


if __name__ == "__main__":
    key = jax.random.PRNGKey(0)

    # Small, forward-consistent shapes.
    num_nodes = 64
    in_channels = 16
    hidden_channels = 32
    out_channels = 8
    num_layers = 3
    num_edges = 256

    k_x, k_src, k_dst, k_params = jax.random.split(key, 4)
    x = jax.random.normal(k_x, (num_nodes, in_channels), jnp.float32)
    edge_index = jnp.stack(
        [
            jax.random.randint(k_src, (num_edges,), 0, num_nodes),
            jax.random.randint(k_dst, (num_edges,), 0, num_nodes),
        ],
        axis=0,
    )  # [2, E], row 0 = source, row 1 = target

    params = init_gnn_params(
        k_params, in_channels, hidden_channels, out_channels, num_layers
    )

    out = gnn_forward(x, edge_index, params)
    out = jax.block_until_ready(out)

    ref = gnn_forward_reference(x, edge_index, params)
    assert out.shape == (num_nodes, out_channels)
    assert jnp.allclose(out, ref, atol=1e-3, rtol=1e-3)

    print("KERNEL_OK")
</pallas_src>

<mosaic_0001>
module attributes {stable_mosaic.version = 11 : i64} {
  func.func @fused_sage_kernel(%arg0: i32, %arg1: memref<128x128xbf16, #tpu.memory_space<vmem>>, %arg2: memref<128x128xbf16, #tpu.memory_space<any>>, %arg3: memref<128x1xf32, #tpu.memory_space<vmem>>, %arg4: memref<1x128x256xbf16, #tpu.memory_space<vmem>>, %arg5: memref<1x1x128xf32, #tpu.memory_space<vmem>>, %arg6: memref<128x128xf32, #tpu.memory_space<vmem>>, %arg7: memref<128x128xbf16, #tpu.memory_space<vmem>>, %arg8: memref<!tpu.dma_semaphore, #tpu.memory_space<semaphore_mem>>) attributes {dimension_semantics = [#tpu.dimension_semantics<arbitrary>], iteration_bounds = array<i64: 3>, scalar_prefetch = 0 : i64, scratch_operands = 2 : i64, tpu.core_type = #tpu.core_type<tc>, window_params = [{pipeline_mode = #tpu.pipeline_mode<synchronous>, transform_indices = @transform_0, window_bounds = array<i64: 128, 128>}, {}, {pipeline_mode = #tpu.pipeline_mode<synchronous>, transform_indices = @transform_2, window_bounds = array<i64: 128, 1>}, {transform_indices = @transform_3, window_bounds = array<i64: 1, 128, 256>}, {transform_indices = @transform_4, window_bounds = array<i64: 1, 1, 128>}, {pipeline_mode = #tpu.pipeline_mode<synchronous>, transform_indices = @transform_5, window_bounds = array<i64: 128, 128>}]} {
    %c0_i32 = arith.constant 0 : i32
    %0 = arith.cmpi eq, %arg0, %c0_i32 : i32
    %1 = arith.extui %0 : i1 to i32
    %c0_i32_0 = arith.constant 0 : i32
    %2 = arith.cmpi ne, %1, %c0_i32_0 : i32
    scf.if %2 {
      tpu.enqueue_dma source(%arg2 : memref<128x128xbf16, #tpu.memory_space<any>>) target(%arg7 : memref<128x128xbf16, #tpu.memory_space<vmem>>) target_semaphore(%arg8 : memref<!tpu.dma_semaphore, #tpu.memory_space<semaphore_mem>>)
      %c0_22 = arith.constant 0 : index
      %c0_23 = arith.constant 0 : index
      %30 = vector.load %arg1[%c0_22, %c0_23] : memref<128x128xbf16, #tpu.memory_space<vmem>>, vector<128x128xbf16>
      %31 = arith.extf %30 : vector<128x128xbf16> to vector<128x128xf32>
      %c0_24 = arith.constant 0 : index
      %c0_25 = arith.constant 0 : index
      %32 = vector.load %arg6[%c0_24, %c0_25] : memref<128x128xf32, #tpu.memory_space<vmem>>, vector<128x128xf32>
      tpu.vector_store %arg6[%c0_24, %c0_25], %31 {strides = array<i32>} : memref<128x128xf32, #tpu.memory_space<vmem>>, vector<128x128xf32>,
    } else {
    }
    %c0 = arith.constant 0 : index
    %c0_1 = arith.constant 0 : index
    %3 = vector.load %arg6[%c0, %c0_1] : memref<128x128xf32, #tpu.memory_space<vmem>>, vector<128x128xf32>
    %4 = arith.truncf %3 : vector<128x128xf32> to vector<128x128xbf16>
    %c0_2 = arith.constant 0 : index
    %c0_3 = arith.constant 0 : index
    %c0_4 = arith.constant 0 : index
    %5 = vector.load %arg4[%c0_2, %c0_3, %c0_4] : memref<1x128x256xbf16, #tpu.memory_space<vmem>>, vector<1x128x256xbf16>
    %6 = vector.shape_cast %5 : vector<1x128x256xbf16> to vector<128x256xbf16>
    %cst = arith.constant dense<0.000000e+00> : vector<128x256xf32>
    %7 = tpu.matmul %4, %6, %cst {dimension_numbers = #tpu.dot_dimension_numbers<[1], [0], [0], [1], [0, 0, 1, 1], [], []>} : vector<128x128xbf16>, vector<128x256xbf16>, vector<128x256xf32> -> vector<128x256xf32>
    %8 = vector.extract_strided_slice %7 {offsets = [0, 0], sizes = [128, 128], strides = [1, 1]} : vector<128x256xf32> to vector<128x128xf32>
    %9 = arith.truncf %8 : vector<128x128xf32> to vector<128x128xbf16>
    %10 = vector.extract_strided_slice %7 {offsets = [0, 128], sizes = [128, 128], strides = [1, 1]} : vector<128x256xf32> to vector<128x128xf32>
    %c0_5 = arith.constant 0 : index
    %c0_6 = arith.constant 0 : index
    %c0_7 = arith.constant 0 : index
    %11 = vector.load %arg5[%c0_5, %c0_6, %c0_7] : memref<1x1x128xf32, #tpu.memory_space<vmem>>, vector<1x1x128xf32>
    %12 = vector.shape_cast %11 : vector<1x1x128xf32> to vector<1x128xf32>
    %13 = vector.broadcast %12 : vector<1x128xf32> to vector<128x128xf32>
    %14 = arith.addf %10, %13 : vector<128x128xf32>
    %c0_8 = arith.constant 0 : index
    %c0_9 = arith.constant 0 : index
    %15 = vector.load %arg6[%c0_8, %c0_9] : memref<128x128xf32, #tpu.memory_space<vmem>>, vector<128x128xf32>
    tpu.vector_store %arg6[%c0_8, %c0_9], %14 {strides = array<i32>} : memref<128x128xf32, #tpu.memory_space<vmem>>, vector<128x128xf32>,
    %c0_i32_10 = arith.constant 0 : i32
    %16 = arith.cmpi eq, %arg0, %c0_i32_10 : i32
    %17 = arith.extui %16 : i1 to i32
    %c0_i32_11 = arith.constant 0 : i32
    %18 = arith.cmpi ne, %17, %c0_i32_11 : i32
    scf.if %18 {
      tpu.wait_dma2 semaphore(%arg8 : memref<!tpu.dma_semaphore, #tpu.memory_space<semaphore_mem>>) src(%arg2 : memref<128x128xbf16, #tpu.memory_space<any>>) dst(%arg7 : memref<128x128xbf16, #tpu.memory_space<vmem>>)
    } else {
    }
    %c0_12 = arith.constant 0 : index
    %c0_13 = arith.constant 0 : index
    %19 = vector.load %arg7[%c0_12, %c0_13] : memref<128x128xbf16, #tpu.memory_space<vmem>>, vector<128x128xbf16>
    %cst_14 = arith.constant dense<0.000000e+00> : vector<128x128xf32>
    %20 = tpu.matmul %19, %9, %cst_14 {dimension_numbers = #tpu.dot_dimension_numbers<[1], [0], [0], [1], [0, 0, 1, 1], [], []>} : vector<128x128xbf16>, vector<128x128xbf16>, vector<128x128xf32> -> vector<128x128xf32>
    %c0_15 = arith.constant 0 : index
    %c0_16 = arith.constant 0 : index
    %21 = vector.load %arg6[%c0_15, %c0_16] : memref<128x128xf32, #tpu.memory_space<vmem>>, vector<128x128xf32>
    %c0_17 = arith.constant 0 : index
    %c0_18 = arith.constant 0 : index
    %22 = vector.load %arg3[%c0_17, %c0_18] : memref<128x1xf32, #tpu.memory_space<vmem>>, vector<128x1xf32>
    %23 = vector.broadcast %22 : vector<128x1xf32> to vector<128x128xf32>
    %24 = arith.mulf %20, %23 : vector<128x128xf32>
    %25 = arith.addf %21, %24 : vector<128x128xf32>
    %c0_19 = arith.constant 0 : index
    %c0_20 = arith.constant 0 : index
    %26 = vector.load %arg6[%c0_19, %c0_20] : memref<128x128xf32, #tpu.memory_space<vmem>>, vector<128x128xf32>
    tpu.vector_store %arg6[%c0_19, %c0_20], %25 {strides = array<i32>} : memref<128x128xf32, #tpu.memory_space<vmem>>, vector<128x128xf32>,
    %c2_i32 = arith.constant 2 : i32
    %27 = arith.cmpi slt, %arg0, %c2_i32 : i32
    %28 = arith.extui %27 : i1 to i32
    %c0_i32_21 = arith.constant 0 : i32
    %29 = arith.cmpi ne, %28, %c0_i32_21 : i32
    scf.if %29 {
      %c0_22 = arith.constant 0 : index
      %c0_23 = arith.constant 0 : index
      %30 = vector.load %arg6[%c0_22, %c0_23] : memref<128x128xf32, #tpu.memory_space<vmem>>, vector<128x128xf32>
      %cst_24 = arith.constant 0.000000e+00 : f32
      %31 = vector.broadcast %cst_24 : f32 to vector<128x128xf32>
      %32 = arith.maximumf %30, %31 : vector<128x128xf32>
      %c0_25 = arith.constant 0 : index
      %c0_26 = arith.constant 0 : index
      %33 = vector.load %arg6[%c0_25, %c0_26] : memref<128x128xf32, #tpu.memory_space<vmem>>, vector<128x128xf32>
      tpu.vector_store %arg6[%c0_25, %c0_26], %32 {strides = array<i32>} : memref<128x128xf32, #tpu.memory_space<vmem>>, vector<128x128xf32>,
    } else {
    }
    return
  }
  func.func @transform_0(%arg0: i32) -> (i32, i32) {
    %c0_i32 = arith.constant 0 : i32
    %c0_i32_0 = arith.constant 0 : i32
    %c0_i32_1 = arith.constant 0 : i32
    return %c0_i32, %c0_i32_0 : i32, i32
  }
  func.func @transform_2(%arg0: i32) -> (i32, i32) {
    %c0_i32 = arith.constant 0 : i32
    %c0_i32_0 = arith.constant 0 : i32
    %c0_i32_1 = arith.constant 0 : i32
    return %c0_i32, %c0_i32_0 : i32, i32
  }
  func.func @transform_3(%arg0: i32) -> (i32, i32, i32) {
    %c0_i32 = arith.constant 0 : i32
    %c0_i32_0 = arith.constant 0 : i32
    %c0_i32_1 = arith.constant 0 : i32
    return %arg0, %c0_i32, %c0_i32_0 : i32, i32, i32
  }
  func.func @transform_4(%arg0: i32) -> (i32, i32, i32) {
    %c0_i32 = arith.constant 0 : i32
    %c0_i32_0 = arith.constant 0 : i32
    %c0_i32_1 = arith.constant 0 : i32
    return %arg0, %c0_i32, %c0_i32_0 : i32, i32, i32
  }
  func.func @transform_5(%arg0: i32) -> (i32, i32) {
    %c0_i32 = arith.constant 0 : i32
    %c0_i32_0 = arith.constant 0 : i32
    %c0_i32_1 = arith.constant 0 : i32
    return %c0_i32, %c0_i32_0 : i32, i32
  }
}

</mosaic_0001>

<bundles_post_ra>
// kernel: tpu_custom_call.1
= control target key start
LH: loop header
LB: loop body
LE: loop exit
PB: predicated region body
PF: predicated region fallthrough
CT: control target
= control target key end

     0   :  { %10 = vsyncpa [#allocation5], 0  ;;  %s1827_s0 = inlined_call_operand.hbm [shape: bf16[128,128], index: 0, kind: input, shape index: {}]   ;;  %s1828_s1 = inlined_call_operand.hbm [shape: bf16[128,128], index: 1, kind: input, shape index: {}]   ;;  %s1829_s2 = inlined_call_operand.hbm [shape: f32[128,1], index: 2, kind: input, shape index: {}]   ;;  %s1830_s3 = inlined_call_operand.hbm [shape: bf16[3,128,256], index: 3, kind: input, shape index: {}]   ;;  %s1831_s4 = inlined_call_operand.hbm [shape: f32[3,1,128], index: 4, kind: input, shape index: {}]   ;;  %s1832_s5 = inlined_call_operand.hbm [shape: f32[128,128], index: 5, kind: output, shape index: {}]  }
   0x1   :  { %11 = vsyncpa [#allocation8], 0 }
   0x2   :  { %12 = vsyncpa [#allocation6], 0  ;;  %s1526_s18 = smov 0   ;;  %s1528_s19 = smov 0  }
   0x3   :  { %s1530_s20 = smov 0   ;;  %s1532_s21 = smov 0  }
   0x4 LB: > { %s1545_s22 = sadd.s32 4294967295, %s1481_s21   ;;  %s1548_s23 = sadd.s32 1, %s1481_s21   ;;  %s1481_s21 = sphi %s1532_s21, %s1863_s21   ;;  %s1477_s20 = sphi %s1530_s20, %s1862_s20   ;;  %s1473_s19 = sphi %s1528_s19, %s1861_s19   ;;  %s1469_s18 = sphi %s1526_s18, %s1860_s18  }
   0x5   : > { %s64_s24 = ssub.s32 %s1481_s21, %s1548_s23  ;;  %s67_s25 = sadd.s32 1, %s1477_s20 }
   0x6   : > { %p65_p0 = scmp.eq.s32.totalorder %s64_s24, 0  ;;  %p74_p1 = scmp.ne.s32.totalorder %s1477_s20, %s1473_s19 }
   0x7   : > { %p75_p2 = scmp.eq.s32.totalorder %s1481_s21, 0  ;;  %p80_p3 = scmp.ne.s32.totalorder %s1473_s19, %s1469_s18 }
   0x8   : > { %s1558_s26 = scalar_select %p65_p0, %s1477_s20, %s67_s25  }
   0x9   : > { %p1560_p4 = por %p75_p2, %p74_p1  ;;  %p1833_p5 = scmp.eq.s32.totalorder %s1545_s22, 0 }
   0xa   : > { %p1033_p6 = scmp.ge.s32.totalorder %s1481_s21, 1  ;;  %p138_p7 = scmp.lt.s32.totalorder %s1481_s21, 4 }
   0xb   : > { %p1569_p8 = por %p1833_p5, %p80_p3  ;;  %s1483_s30 = smov [#allocation4]  }
   0xc   : > { %p1574_p10 = pnand %p1033_p6, %p138_p7  ;;  %s150_s6 = sshll.u32 %s1483_s30, 4  ;;  %s151_s6 = int_to_ptr.vmem [resolvable:$true] %s150_s6 }
   0xd   : > { %s1841_s28 = scalar_select %p1569_p8, 1, 0 }
   0xe   : > { %s1842_s29 = scalar_select %p1574_p10, 1, 0 }
   0xf   : > { %p1176_p11 = pneg %p1574_p10  ;;  %p1192_p13 = scmp.lt.s32.totalorder %s1481_s21, 3 }
  0x10   : > { %s1267_s11 = scalar_lea.hbm %s1827_s0, 1024 }
  0x11   : > { %p1582_p12 = pnand %p1176_p11, %p1833_p5  ;;  %p1589_p0 = pnand %p1192_p13, %p1560_p4 }
  0x12   : > { %p1268_p1 = scmp.ne.s32.totalorder %s1827_s0, %s1267_s11  ;;  %p1274_p4 = scmp.lt.u32.totalorder %s1267_s11, %s1827_s0 }
  0x13   : > { %s1844_s8 = scalar_select %p1589_p0, 1, 0 }
  0x14   : > { %p1837_p2 = pneg %p1582_p12 }
  0x16   : > { %p1270_p3 = pnand %p1837_p2, %p1268_p1 }
  0x18   : > { %p1271_p6 = pneg %p1270_p3 }
  0x1a   : > { %p1276_p7 = pnand %p1274_p4, %p1271_p6 }
  0x1c   : > { %1279 = shalt.err (!%p1276_p7)
}
  0x1d   : > { %s1280_s16 = scalar_lea.vmem %s151_s6, 1024  ;;  %p1288_p5 = scmp.lt.s32.totalorder %s151_s6, %s151_s6 }
  0x1e   : > { %p1281_p11 = scmp.ne.s32.totalorder %s151_s6, %s1280_s16  ;;  %p1289_p8 = scmp.lt.s32.totalorder %s1280_s16, %s1280_s16 }
  0x20   : > { %p1283_p13 = pnand %p1281_p11, %p1837_p2  ;;  %p1290_p10 = por %p1289_p8, %p1288_p5 }
  0x22   : > { %p1284_p9 = pneg %p1283_p13 }
  0x24   : > { %p1291_p0 = pnand %p1290_p10, %p1284_p9 }
  0x26   : > { %1294 = shalt.err (!%p1291_p0)
}
  0x27   : > { %s1484_s17 = smov 64   ;;  %s1485_s18 = smov 4  }
  0x28   : > { %1179 = dma.hbm_to_vmem [thread:$0]  (!%p1582_p12), %s1827_s0, 1024, %s151_s6, [#allocation5], %s1484_s17, %s1484_s17, %s1485_s18  }
  0x29   : > { %s177_s27 = sand.u32 1, %s1481_s21   ;;  %s179_s30 = sand.u32 1, %s1477_s20  }
  0x2a   : > { %s1037_s9 = sshll.u32 %s179_s30, 7  ;;  %s1070_s10 = sshll.u32 %s1481_s21, 11 }
  0x2b   : > { %s1623_s13 = scalar_lea.hbm %s1830_s3, %s1070_s10  ;;  %s181_s14 = scalar_lea.vmem [#allocation9], %s1037_s9 }
  0x2c   : > { %s188_s15 = sshll.u32 %s181_s14, 4  ;;  %s1486_s16 = smov [#allocation7]   ;;  %s1625_s15 = int_to_ptr.vmem [resolvable:$true] %s188_s15 }
  0x2d   : > { %s1627_s6 = sshll.u32 %s1486_s16, 4  ;;  %s1629_s17 = scalar_lea.sflag [#allocation5], %s177_s27  ;;  %s164_s6 = int_to_ptr.vmem [resolvable:$true] %s1627_s6 }
  0x2e   : > { %s1295_s18 = scalar_lea.hbm %s1623_s13, 2048  ;;  %p1845_p8 = scmp.ne.s32.totalorder %s1844_s8, 0 }
  0x2f   : > { %p1296_p5 = scmp.ne.s32.totalorder %s1623_s13, %s1295_s18  ;;  %s1300_s9 = scalar_lea.hbm %s1830_s3, 6144 }
  0x30   : > { %p1838_p9 = pneg %p1845_p8  ;;  %p1301_p1 = scmp.lt.u32.totalorder %s1623_s13, %s1830_s3 }
  0x31   : > { %p1302_p3 = scmp.lt.u32.totalorder %s1300_s9, %s1295_s18  ;;  %p1304_p4 = scmp.lt.u32.totalorder %s1295_s18, %s1623_s13 }
  0x32   : > { %p1298_p10 = pnand %p1838_p9, %p1296_p5 }
  0x33   : > { %p1303_p6 = por %p1302_p3, %p1301_p1 }
  0x34   : > { %p1299_p0 = pneg %p1298_p10 }
  0x35   : > { %p1305_p7 = por %p1304_p4, %p1303_p6 }
  0x37   : > { %p1306_p11 = pnand %p1305_p7, %p1299_p0 }
  0x39   : > { %1309 = shalt.err (!%p1306_p11)
}
  0x3a   : > { %s1310_s27 = scalar_lea.vmem %s1625_s15, 2048  ;;  %s1487_s12 = smov [#allocation9]  }
  0x3b   : > { %p1311_p13 = scmp.ne.s32.totalorder %s1625_s15, %s1310_s27  ;;  %s1315_s14 = sshll.u32 %s1487_s12, 4  ;;  %s1316_s14 = int_to_ptr.vmem [resolvable:$false] %s1315_s14 }
  0x3c   : > { %s1317_s16 = scalar_lea.vmem %s1316_s14, 4096  ;;  %p1318_p2 = scmp.lt.s32.totalorder %s1625_s15, %s1316_s14 }
  0x3d   : > { %p1313_p5 = pnand %p1311_p13, %p1838_p9  ;;  %p1319_p1 = scmp.lt.s32.totalorder %s1317_s16, %s1310_s27 }
  0x3f   : > { %p1314_p10 = pneg %p1313_p5  ;;  %p1320_p3 = por %p1319_p1, %p1318_p2 }
  0x41   : > { %p1321_p6 = pnand %p1320_p3, %p1314_p10 }
  0x43   : > { %1324 = shalt.err (!%p1321_p6)
}
  0x44   : > { %s1488_s18 = smov 128   ;;  %s1489_s24 = smov 8  }
  0x45   : > { %1186 = dma.hbm_to_vmem [thread:$0]  (!%p1845_p8), %s1623_s13, 2048, %s1625_s15, %s1629_s17, %s1488_s18, %s1488_s18, %s1489_s24  }
  0x46   : > { %s1325_s10 = scalar_lea.hbm %s1829_s2, 2048  ;;  %p1846_p0 = pneg %p1582_p12 }
  0x47   : > { %p1326_p2 = scmp.ne.s32.totalorder %s1829_s2, %s1325_s10  ;;  %p1332_p11 = scmp.lt.u32.totalorder %s1325_s10, %s1829_s2 }
  0x49   : > { %p1328_p4 = pnand %p1326_p2, %p1846_p0 }
  0x4b   : > { %p1329_p7 = pneg %p1328_p4 }
  0x4d   : > { %p1334_p13 = pnand %p1332_p11, %p1329_p7 }
  0x4f   : > { %1337 = shalt.err (!%p1334_p13)
}
  0x50   : > { %s1338_s13 = scalar_lea.vmem %s164_s6, 2048  ;;  %p1847_p10 = pmov %p1846_p0 }
  0x51   : > { %p1339_p5 = scmp.ne.s32.totalorder %s164_s6, %s1338_s13  ;;  %p1346_p6 = scmp.lt.s32.totalorder %s164_s6, %s164_s6 }
  0x52   : > { %p1347_p9 = scmp.lt.s32.totalorder %s1338_s13, %s1338_s13 }
  0x53   : > { %p1341_p1 = pnand %p1339_p5, %p1847_p10 }
  0x54   : > { %p1348_p8 = por %p1347_p9, %p1346_p6 }
  0x55   : > { %p1342_p3 = pneg %p1341_p1 }
  0x57   : > { %p1349_p0 = pnand %p1348_p8, %p1342_p3 }
  0x59   : > { %1352 = shalt.err (!%p1349_p0)
}
  0x5a   : > { %1182 = dma.hbm_to_vmem [thread:$0]  (!%p1582_p12), %s1829_s2, 2048, %s164_s6, [#allocation8], %s1488_s18, %s1488_s18, %s1489_s24  }
  0x5b   : > { %s1040_s25 = sshll.u32 %s1481_s21, 4  ;;  %s201_s9 = scalar_lea.vmem [#allocation10], %s179_s30 }
  0x5c   : > { %s208_s10 = sshll.u32 %s201_s9, 4  ;;  %s206_s12 = scalar_lea.hbm %s1831_s4, %s1040_s25  ;;  %s209_s10 = int_to_ptr.vmem [resolvable:$true] %s208_s10 }
  0x5d   : > { %s1353_s14 = scalar_lea.hbm %s206_s12, 16  ;;  %p1848_p9 = scmp.ne.s32.totalorder %s1844_s8, 0 }
  0x5e   : > { %p1354_p8 = scmp.ne.s32.totalorder %s206_s12, %s1353_s14  ;;  %s1358_s15 = scalar_lea.hbm %s1831_s4, 48 }
  0x5f   : > { %p1849_p2 = pneg %p1848_p9  ;;  %p1359_p12 = scmp.lt.u32.totalorder %s206_s12, %s1831_s4 }
  0x60   : > { %p1360_p11 = scmp.lt.u32.totalorder %s1358_s15, %s1353_s14  ;;  %p1362_p5 = scmp.lt.u32.totalorder %s1353_s14, %s206_s12 }
  0x61   : > { %p1356_p4 = pnand %p1354_p8, %p1849_p2 }
  0x62   : > { %p1361_p13 = por %p1360_p11, %p1359_p12 }
  0x63   : > { %p1357_p7 = pneg %p1356_p4 }
  0x64   : > { %p1363_p10 = por %p1362_p5, %p1361_p13 }
  0x66   : > { %p1364_p1 = pnand %p1363_p10, %p1357_p7 }
  0x68   : > { %1367 = shalt.err (!%p1364_p1)
}
  0x69   : > { %s1368_s30 = scalar_lea.vmem %s209_s10, 16  ;;  %p1850_p6 = pmov %p1849_p2 }
  0x6a   : > { %p1369_p3 = scmp.ne.s32.totalorder %s209_s10, %s1368_s30  ;;  %s1490_s18 = smov [#allocation10]  }
  0x6b   : > { %s1373_s24 = sshll.u32 %s1490_s18, 4  ;;  %s1374_s24 = int_to_ptr.vmem [resolvable:$false] %s1373_s24 }
  0x6c   : > { %p1371_p0 = pnand %p1369_p3, %p1850_p6  ;;  %s1375_s16 = scalar_lea.vmem %s1374_s24, 32 }
  0x6d   : > { %p1376_p2 = scmp.lt.s32.totalorder %s209_s10, %s1374_s24  ;;  %p1377_p4 = scmp.lt.s32.totalorder %s1375_s16, %s1368_s30 }
  0x6e   : > { %p1372_p8 = pneg %p1371_p0 }
  0x6f   : > { %p1378_p11 = por %p1377_p4, %p1376_p2 }
  0x71   : > { %p1379_p12 = pnand %p1378_p11, %p1372_p8 }
  0x73   : > { %1382 = shalt.err (!%p1379_p12)
}
  0x74   : > { %1189 = dma.hbm_to_vmem [thread:$0]  (!%p1848_p9), %s206_s12, 16, %s209_s10, %s1629_s17  }
  0x75   : > { %p1851_p7 = scmp.ne.s32.totalorder %s1842_s29, 0 }
  0x76   : > { %p1852_p13 = scmp.eq.s32.totalorder (!%p1851_p7), %s1545_s22, 0 }
  0x77   : > { %217 = sbr.rel (%p1851_p7) target bundleno = 781 (0x30d), region = 36 }
  0x7e   : > { %1448 = dma.done.wait (%p1852_p13), [#allocation5], 1024   ;;  %p1853_p5 = pmov %p1852_p13 }
  0x80   : > { %1450 = vsyncadd (%p1853_p5), [#allocation5], 4294966272  ;;  %p1854_p10 = pmov %p1853_p5 }
  0x81   : > { %p1855_p1 = pmov %p1853_p5 }
  0x82   : > { %1452 = dma.done.wait (%p1854_p10), [#allocation8], 2048  }
  0x83   : > { %1454 = vsyncadd (%p1855_p1), [#allocation8], 4294965248  ;;  %s227_s8 = sand.u32 1, %s1545_s22   ;;  %s229_s17 = sand.u32 1, %s1473_s19  }
  0x84   : > { %s1044_s25 = sshll.u32 %s229_s17, 7  ;;  %s228_s29 = scalar_lea.sflag [#allocation5], %s227_s8 }
  0x85   : > { %s1711_s9 = scalar_lea.vmem [#allocation9], %s1044_s25  ;;  %p1856_p9 = scmp.ne.s32.totalorder %s1841_s28, 0 }
  0x87   : > { %1456 = dma.done.wait (%p1856_p9), %s228_s29, 2064  }
  0x88   : > { %1458 = vsyncadd (%p1856_p9), %s228_s29, 4294965232  ;;  %s1717_s10 = scalar_lea.vmem [#allocation10], %s229_s17  ;;  %p1857_p3 = scmp.ne.s32.totalorder %s1545_s22, 0 }
  0x89   : > { %v1072_v0 = vld [vmem:[#allocation4] sm:$0xff] (!%p1857_p3)   ;;  %v1103_v1 = vld [vmem:[#allocation4 + $0x8] sm:$0xff] (!%p1857_p3)   ;;  %v1104_v2 = vld [vmem:[#allocation4 + $0x10] sm:$0xff] (!%p1857_p3)   ;;  %s1491_s11 = smov (!%p1857_p3), [#allocation2]   ;;  %s1383_s14 = scalar_lea.hbm (!%p1857_p3), %s1828_s1, 1024 }
  0x8a   : > { %267 = sbr.rel (%p1857_p3) target bundleno = 162 (0xa2), region = 56  ;;  %s275_s27 = sshll.u32 (!%p1857_p3), %s1491_s11, 4  ;;  %v1073_v3 = vunpack.c.l.bf16 (!%p1857_p3), %v1072_v0  ;;  %v1074_v4 = vunpack.c.h.bf16 (!%p1857_p3), %v1072_v0  ;;  %v1077_v5 = vunpack.c.l.bf16 (!%p1857_p3), %v1103_v1  ;;  %v1078_v6 = vunpack.c.h.bf16 (!%p1857_p3), %v1103_v1  ;;  %v1105_v7 = vld [vmem:[#allocation4 + $0x18] sm:$0xff] (!%p1857_p3)   ;;  %v1106_v8 = vld [vmem:[#allocation4 + $0x20] sm:$0xff] (!%p1857_p3)   ;;  %v1107_v9 = vld [vmem:[#allocation4 + $0x28] sm:$0xff] (!%p1857_p3)   ;;  %s276_s27 = int_to_ptr.vmem [resolvable:$true] %s275_s27 }
  0x8b   : > { %v1081_v10 = vunpack.c.l.bf16 (!%p1857_p3), %v1104_v2  ;;  %v1082_v11 = vunpack.c.h.bf16 (!%p1857_p3), %v1104_v2  ;;  %v1085_v12 = vunpack.c.l.bf16 (!%p1857_p3), %v1105_v7  ;;  %v1086_v13 = vunpack.c.h.bf16 (!%p1857_p3), %v1105_v7  ;;  %v1108_v14 = vld [vmem:[#allocation4 + $0x30] sm:$0xff] (!%p1857_p3)   ;;  %v1109_v15 = vld [vmem:[#allocation4 + $0x38] sm:$0xff] (!%p1857_p3)   ;;  %p1384_p6 = scmp.ne.s32.totalorder (!%p1857_p3), %s1828_s1, %s1383_s14  ;;  %p1387_p0 = scmp.lt.u32.totalorder (!%p1857_p3), %s1383_s14, %s1828_s1 }
  0x8d   : > { %p1389_p8 = pnand (!%p1857_p3), %p1387_p0, %p1384_p6 }
  0x91   : > { %1392 = shalt.err (!%p1389_p8)  }
  0x92   : > { %s1393_s21 = scalar_lea.vmem %s276_s27, 1024  ;;  %p1398_p4 = scmp.lt.s32.totalorder %s276_s27, %s276_s27 }
  0x93   : > { %p1394_p2 = scmp.ne.s32.totalorder %s276_s27, %s1393_s21  ;;  %p1399_p11 = scmp.lt.s32.totalorder %s1393_s21, %s1393_s21 }
  0x95   : > { %p1400_p12 = por %p1399_p11, %p1398_p4 }
  0x97   : > { %p1401_p7 = pnand %p1400_p12, %p1394_p2 }
  0x99   : > { %1404 = shalt.err (!%p1401_p7)  }
  0x9a   : > { %278 = dma.hbm_to_vmem [thread:$0]  %s1828_s1, 1024, %s276_s27, [#allocation3]  ;;  %311 = vst [vmem:[#allocation11] sm:$0xff] %v1073_v3  ;;  %312 = vst [vmem:[#allocation11 + $0x8] sm:$0xff] %v1074_v4  ;;  %v1089_v16 = vunpack.c.l.bf16 %v1106_v8  ;;  %v1090_v17 = vunpack.c.h.bf16 %v1106_v8  ;;  %v1093_v18 = vunpack.c.l.bf16 %v1107_v9  ;;  %v1094_v19 = vunpack.c.h.bf16 %v1107_v9 }
  0x9b   : > { %313 = vst [vmem:[#allocation11 + $0x10] sm:$0xff] %v1077_v5  ;;  %314 = vst [vmem:[#allocation11 + $0x18] sm:$0xff] %v1078_v6  ;;  %v1097_v20 = vunpack.c.l.bf16 %v1108_v14  ;;  %v1098_v21 = vunpack.c.h.bf16 %v1108_v14  ;;  %v1101_v22 = vunpack.c.l.bf16 %v1109_v15  ;;  %v1102_v23 = vunpack.c.h.bf16 %v1109_v15 }
  0x9c   : > { %315 = vst [vmem:[#allocation11 + $0x20] sm:$0xff] %v1081_v10  ;;  %316 = vst [vmem:[#allocation11 + $0x28] sm:$0xff] %v1082_v11 }
  0x9d   : > { %317 = vst [vmem:[#allocation11 + $0x30] sm:$0xff] %v1085_v12  ;;  %318 = vst [vmem:[#allocation11 + $0x38] sm:$0xff] %v1086_v13 }
  0x9e   : > { %319 = vst [vmem:[#allocation11 + $0x40] sm:$0xff] %v1089_v16  ;;  %320 = vst [vmem:[#allocation11 + $0x48] sm:$0xff] %v1090_v17 }
  0x9f   : > { %321 = vst [vmem:[#allocation11 + $0x50] sm:$0xff] %v1093_v18  ;;  %322 = vst [vmem:[#allocation11 + $0x58] sm:$0xff] %v1094_v19 }
  0xa0   : > { %323 = vst [vmem:[#allocation11 + $0x60] sm:$0xff] %v1097_v20  ;;  %324 = vst [vmem:[#allocation11 + $0x68] sm:$0xff] %v1098_v21 }
  0xa1   : > { %325 = vst [vmem:[#allocation11 + $0x70] sm:$0xff] %v1101_v22  ;;  %326 = vst [vmem:[#allocation11 + $0x78] sm:$0xff] %v1102_v23 }
  0xa2 PF: > { %v1241_v24 = vld [vmem:[%s1711_s9 + $0x4] ss:$8 sps:$4 sm:$0xff]   ;;  %v1243_v25 = vld [vmem:[%s1711_s9] ss:$8 sps:$4 sm:$0xff]   ;;  %v1492_v26 = vmov 0   ;;  %v329_v44 = vld [vmem:[#allocation11 + $0x10] sm:$0xff] }
  0xa3   : > { %479 = vmatprep.mubr.bf16.mxu0 %v1492_v26  ;;  %447 = vmatprep.subr.bf16.mxu0 %v1241_v24  ;;  %v1244_v27 = vld [vmem:[%s1711_s9 + $0x14] ss:$8 sps:$4 sm:$0xff]   ;;  %v1246_v28 = vld [vmem:[%s1711_s9 + $0x10] ss:$8 sps:$4 sm:$0xff]   ;;  %v1247_v29 = vld [vmem:[%s1711_s9 + $0x24] ss:$8 sps:$4 sm:$0xff]  }
  0xa4   : > { %448 = vmatpush1.bf16.msra.mxu0 %v1243_v25  ;;  %v1249_v30 = vld [vmem:[%s1711_s9 + $0x20] ss:$8 sps:$4 sm:$0xff]   ;;  %v1250_v31 = vld [vmem:[%s1711_s9 + $0x34] ss:$8 sps:$4 sm:$0xff]   ;;  %v1252_v32 = vld [vmem:[%s1711_s9 + $0x30] ss:$8 sps:$4 sm:$0xff]  }
  0xa5   : > { %449 = vmatprep.subr.bf16.mxu0 %v1244_v27  ;;  %v1253_v33 = vld [vmem:[%s1711_s9 + $0x44] ss:$8 sps:$4 sm:$0xff]   ;;  %v1255_v34 = vld [vmem:[%s1711_s9 + $0x40] ss:$8 sps:$4 sm:$0xff]   ;;  %v1256_v35 = vld [vmem:[%s1711_s9 + $0x54] ss:$8 sps:$4 sm:$0xff]  }
  0xa6   : > { %v1258_v36 = vld [vmem:[%s1711_s9 + $0x50] ss:$8 sps:$4 sm:$0xff]   ;;  %v1259_v37 = vld [vmem:[%s1711_s9 + $0x64] ss:$8 sps:$4 sm:$0xff]   ;;  %v1261_v38 = vld [vmem:[%s1711_s9 + $0x60] ss:$8 sps:$4 sm:$0xff]  }
  0xa7   : > { %v1262_v39 = vld [vmem:[%s1711_s9 + $0x74] ss:$8 sps:$4 sm:$0xff]   ;;  %v1264_v40 = vld [vmem:[%s1711_s9 + $0x70] ss:$8 sps:$4 sm:$0xff]   ;;  %v327_v41 = vld [vmem:[#allocation11] sm:$0xff]  ;;  %p1858_p13 = scmp.eq.s32.totalorder %s1545_s22, 0 }
  0xa8   : > { %450 = vmatpush1.bf16.msra.mxu0 %v1246_v28  ;;  %v328_v42 = vld [vmem:[#allocation11 + $0x8] sm:$0xff]  ;;  %v330_v45 = vld [vmem:[#allocation11 + $0x18] sm:$0xff]  ;;  %v331_v47 = vld [vmem:[#allocation11 + $0x20] sm:$0xff] }
  0xa9   : > { %451 = vmatprep.subr.bf16.mxu0 %v1247_v29  ;;  %v343_v43 = vpack.c.bf16 %v328_v42, %v327_v41  ;;  %v344_v46 = vpack.c.bf16 %v330_v45, %v329_v44  ;;  %v332_v48 = vld [vmem:[#allocation11 + $0x28] sm:$0xff]  ;;  %v333_v50 = vld [vmem:[#allocation11 + $0x30] sm:$0xff]  ;;  %v334_v51 = vld [vmem:[#allocation11 + $0x38] sm:$0xff] }
  0xaa   : > { %v345_v49 = vpack.c.bf16 %v332_v48, %v331_v47  ;;  %v346_v52 = vpack.c.bf16 %v334_v51, %v333_v50  ;;  %v335_v53 = vld [vmem:[#allocation11 + $0x40] sm:$0xff]  ;;  %v336_v54 = vld [vmem:[#allocation11 + $0x48] sm:$0xff]  ;;  %v337_v56 = vld [vmem:[#allocation11 + $0x50] sm:$0xff] }
  0xab   : > { %v347_v55 = vpack.c.bf16 %v336_v54, %v335_v53  ;;  %v338_v57 = vld [vmem:[#allocation11 + $0x58] sm:$0xff]  ;;  %v339_v59 = vld [vmem:[#allocation11 + $0x60] sm:$0xff]  ;;  %v340_v60 = vld [vmem:[#allocation11 + $0x68] sm:$0xff] }
  0xac   : > { %452 = vmatpush1.bf16.msra.mxu0 %v1249_v30  ;;  %v348_v58 = vpack.c.bf16 %v338_v57, %v337_v56  ;;  %v349_v61 = vpack.c.bf16 %v340_v60, %v339_v59  ;;  %v341_v62 = vld [vmem:[#allocation11 + $0x70] sm:$0xff]  ;;  %v342_v63 = vld [vmem:[#allocation11 + $0x78] sm:$0xff] }
  0xad   : > { %453 = vmatprep.subr.bf16.mxu0 %v1250_v31  ;;  %v350_v0 = vpack.c.bf16 %v342_v63, %v341_v62  ;;  %v1758_v1 = vld [vmem:[%s1717_s10] ss:$0 sm:$0xff] }
  0xb0   : > { %454 = vmatpush1.bf16.msra.mxu0 %v1252_v32 }
  0xb1   : > { %455 = vmatprep.subr.bf16.mxu0 %v1253_v33 }
  0xb4   : > { %456 = vmatpush1.bf16.msra.mxu0 %v1255_v34 }
  0xb5   : > { %457 = vmatprep.subr.bf16.mxu0 %v1256_v35 }
  0xb8   : > { %458 = vmatpush1.bf16.msra.mxu0 %v1258_v36 }
  0xb9   : > { %459 = vmatprep.subr.bf16.mxu0 %v1259_v37 }
  0xbc   : > { %460 = vmatpush1.bf16.msra.mxu0 %v1261_v38 }
  0xbd   : > { %461 = vmatprep.subr.bf16.mxu0 %v1262_v39 }
  0xc0   : > { %462 = vmatpush1.bf16.msra.mxu0 %v1264_v40 }
  0xc3   : > { %480 = vmatmul.mubr.bf16.vlgmr.msra.gmra.mrb[0].mxu0 %v343_v43 }
  0xc4   : > { %489 = vmatprep.mubr.bf16.mxu0 %v1492_v26 }
  0xcb   : > { %490 = vmatmul.mubr.bf16.gmra.mrb[4].mxu0 %v344_v46 }
  0xcc   : > { %499 = vmatprep.mubr.bf16.mxu0 %v1492_v26 }
  0xd3   : > { %500 = vmatmul.mubr.bf16.gmra.mrb[8].mxu0 %v345_v49 }
  0xd4   : > { %509 = vmatprep.mubr.bf16.mxu0 %v1492_v26 }
  0xdb   : > { %510 = vmatmul.mubr.bf16.gmra.mrb[12].mxu0 %v346_v52 }
  0xdc   : > { %519 = vmatprep.mubr.bf16.mxu0 %v1492_v26 }
  0xe3   : > { %520 = vmatmul.mubr.bf16.gmra.mrb[16].mxu0 %v347_v55 }
  0xe4   : > { %529 = vmatprep.mubr.bf16.mxu0 %v1492_v26 }
  0xeb   : > { %530 = vmatmul.mubr.bf16.gmra.mrb[20].mxu0 %v348_v58 }
  0xec   : > { %539 = vmatprep.mubr.bf16.mxu0 %v1492_v26 }
  0xf3   : > { %540 = vmatmul.mubr.bf16.gmra.mrb[24].mxu0 %v349_v61 }
  0xf4   : > { %549 = vmatprep.mubr.bf16.mxu0 %v1492_v26 }
  0xfb   : > { %550 = vmatmul.mubr.bf16.gmra.mrb[28].mxu0 %v350_v0 }
 0x196   : > { %v481_v2 = vpop.f32.mrb[0].mxu0 }
 0x197   : > { %v483_v3 = vpop.f32.mrb[1].mxu0 }
 0x198   : > { %v575_v4 = vadd.f32 %v1758_v1, %v483_v3  ;;  %v485_v5 = vpop.f32.mrb[2].mxu0 }
 0x199   : > { %v1761_v6 = vpack.c.bf16 %v485_v5, %v481_v2  ;;  %v487_v7 = vpop.f32.mrb[3].mxu0 }
 0x19a   : > { %591 = vst [vmem:[#allocation11] sm:$0xff] %v575_v4  ;;  %v576_v8 = vadd.f32 %v1758_v1, %v487_v7 }
 0x19b   : > { %1126 = vmatprep.subr.bf16.mxu1 %v1761_v6 }
 0x19c   : > { %592 = vst [vmem:[#allocation11 + $0x8] sm:$0xff] %v576_v8 }
 0x19e   : > { %v491_v9 = vpop.f32.mrb[4].mxu0 }
 0x19f   : > { %v493_v10 = vpop.f32.mrb[5].mxu0 }
 0x1a0   : > { %v577_v11 = vadd.f32 %v1758_v1, %v493_v10  ;;  %v495_v12 = vpop.f32.mrb[6].mxu0 }
 0x1a1   : > { %v1765_v13 = vpack.c.bf16 %v495_v12, %v491_v9  ;;  %v497_v14 = vpop.f32.mrb[7].mxu0 }
 0x1a2   : > { %593 = vst [vmem:[#allocation11 + $0x10] sm:$0xff] %v577_v11  ;;  %v578_v15 = vadd.f32 %v1758_v1, %v497_v14 }
 0x1a4   : > { %594 = vst [vmem:[#allocation11 + $0x18] sm:$0xff] %v578_v15 }
 0x1a6   : > { %v501_v16 = vpop.f32.mrb[8].mxu0 }
 0x1a7   : > { %v503_v17 = vpop.f32.mrb[9].mxu0 }
 0x1a8   : > { %v579_v18 = vadd.f32 %v1758_v1, %v503_v17  ;;  %v505_v19 = vpop.f32.mrb[10].mxu0 }
 0x1a9   : > { %v562_v20 = vpack.c.bf16 %v505_v19, %v501_v16  ;;  %v507_v21 = vpop.f32.mrb[11].mxu0 }
 0x1aa   : > { %595 = vst [vmem:[#allocation11 + $0x20] sm:$0xff] %v579_v18  ;;  %v580_v22 = vadd.f32 %v1758_v1, %v507_v21 }
 0x1ac   : > { %596 = vst [vmem:[#allocation11 + $0x28] sm:$0xff] %v580_v22 }
 0x1ae   : > { %v511_v23 = vpop.f32.mrb[12].mxu0 }
 0x1af   : > { %v513_v24 = vpop.f32.mrb[13].mxu0 }
 0x1b0   : > { %v581_v25 = vadd.f32 %v1758_v1, %v513_v24  ;;  %v515_v27 = vpop.f32.mrb[14].mxu0 }
 0x1b1   : > { %v563_v28 = vpack.c.bf16 %v515_v27, %v511_v23  ;;  %v517_v29 = vpop.f32.mrb[15].mxu0 }
 0x1b2   : > { %597 = vst [vmem:[#allocation11 + $0x30] sm:$0xff] %v581_v25  ;;  %v582_v30 = vadd.f32 %v1758_v1, %v517_v29 }
 0x1b4   : > { %598 = vst [vmem:[#allocation11 + $0x38] sm:$0xff] %v582_v30 }
 0x1b6   : > { %v521_v31 = vpop.f32.mrb[16].mxu0 }
 0x1b7   : > { %v523_v32 = vpop.f32.mrb[17].mxu0 }
 0x1b8   : > { %v583_v33 = vadd.f32 %v1758_v1, %v523_v32  ;;  %v525_v34 = vpop.f32.mrb[18].mxu0 }
 0x1b9   : > { %v564_v35 = vpack.c.bf16 %v525_v34, %v521_v31  ;;  %v527_v36 = vpop.f32.mrb[19].mxu0 }
 0x1ba   : > { %599 = vst [vmem:[#allocation11 + $0x40] sm:$0xff] %v583_v33  ;;  %v584_v37 = vadd.f32 %v1758_v1, %v527_v36 }
 0x1bc   : > { %600 = vst [vmem:[#allocation11 + $0x48] sm:$0xff] %v584_v37 }
 0x1be   : > { %v531_v38 = vpop.f32.mrb[20].mxu0 }
 0x1bf   : > { %v533_v39 = vpop.f32.mrb[21].mxu0 }
 0x1c0   : > { %v585_v40 = vadd.f32 %v1758_v1, %v533_v39  ;;  %v535_v41 = vpop.f32.mrb[22].mxu0 }
 0x1c1   : > { %v565_v42 = vpack.c.bf16 %v535_v41, %v531_v38  ;;  %v537_v43 = vpop.f32.mrb[23].mxu0 }
 0x1c2   : > { %601 = vst [vmem:[#allocation11 + $0x50] sm:$0xff] %v585_v40  ;;  %v586_v44 = vadd.f32 %v1758_v1, %v537_v43 }
 0x1c4   : > { %602 = vst [vmem:[#allocation11 + $0x58] sm:$0xff] %v586_v44 }
 0x1c6   : > { %v541_v45 = vpop.f32.mrb[24].mxu0 }
 0x1c7   : > { %v543_v46 = vpop.f32.mrb[25].mxu0 }
 0x1c8   : > { %v587_v47 = vadd.f32 %v1758_v1, %v543_v46  ;;  %v545_v48 = vpop.f32.mrb[26].mxu0 }
 0x1c9   : > { %v566_v49 = vpack.c.bf16 %v545_v48, %v541_v45  ;;  %v547_v50 = vpop.f32.mrb[27].mxu0 }
 0x1ca   : > { %603 = vst [vmem:[#allocation11 + $0x60] sm:$0xff] %v587_v47  ;;  %v588_v51 = vadd.f32 %v1758_v1, %v547_v50 }
 0x1cc   : > { %604 = vst [vmem:[#allocation11 + $0x68] sm:$0xff] %v588_v51 }
 0x1ce   : > { %v551_v52 = vpop.f32.mrb[28].mxu0 }
 0x1cf   : > { %v553_v53 = vpop.f32.mrb[29].mxu0 }
 0x1d0   : > { %v589_v54 = vadd.f32 %v1758_v1, %v553_v53  ;;  %v555_v55 = vpop.f32.mrb[30].mxu0 }
 0x1d1   : > { %v567_v56 = vpack.c.bf16 %v555_v55, %v551_v52  ;;  %v557_v57 = vpop.f32.mrb[31].mxu0 }
 0x1d2   : > { %605 = vst [vmem:[#allocation11 + $0x70] sm:$0xff] %v589_v54  ;;  %v590_v58 = vadd.f32 %v1758_v1, %v557_v57 }
 0x1d4   : > { %606 = vst [vmem:[#allocation11 + $0x78] sm:$0xff] %v590_v58 }
 0x1d5   : > { %1460 = dma.done.wait (%p1858_p13), [#allocation3], 1024  ;;  %p1859_p5 = pmov %p1858_p13 }
 0x1d6   : > { %1266 = vset.pattern.permute.xlu1 %v1492_v26  ;;  %1127 = vmatpush3.bf16.msra.mxu1 %v1761_v6  ;;  %v614_v59 = vld [vmem:[#allocation2] sm:$0xff]  ;;  %v737_v60 = vld [vmem:[#allocation7 + $0x10] sm:$0xff]  ;;  %v738_v62 = vld [vmem:[#allocation7 + $0x18] sm:$0xff]  ;;  %p1064_p10 = scmp.ge.s32.totalorder %s1545_s22, 2 }
 0x1d7   : > { %1462 = vsyncadd (%p1859_p5), [#allocation3], 4294966272  ;;  %1265 = vset.pattern.permute.xlu0 %v1492_v26  ;;  %1128 = vmatprep.subr.bf16.mxu1 %v1765_v13  ;;  %v735_v61 = vld [vmem:[#allocation7] sm:$0xff]  ;;  %v736_v63 = vld [vmem:[#allocation7 + $0x8] sm:$0xff] }
 0x1d8   : > { %1142 = vmatprep.mubr.bf16.mxu1 %v614_v59  ;;  %763 = vperm.xlu1 %1266, %v737_v60   ;;  %v740_v26 = vld [vmem:[#allocation7 + $0x28] sm:$0xff]  ;;  %v739_v0 = vld [vmem:[#allocation7 + $0x20] sm:$0xff]  ;;  %v742_v1 = vld [vmem:[#allocation7 + $0x38] sm:$0xff] }
 0x1d9   : > { %753 = vperm.xlu0 %1265, %v735_v61   ;;  %v741_v2 = vld [vmem:[#allocation7 + $0x30] sm:$0xff]  ;;  %v744_v3 = vld [vmem:[#allocation7 + $0x48] sm:$0xff]  ;;  %v743_v4 = vld [vmem:[#allocation7 + $0x40] sm:$0xff] }
 0x1da   : > { %1129 = vmatpush3.bf16.msra.mxu1 %v1765_v13  ;;  %v746_v5 = vld [vmem:[#allocation7 + $0x58] sm:$0xff]  ;;  %v745_v6 = vld [vmem:[#allocation7 + $0x50] sm:$0xff]  ;;  %v615_v7 = vld [vmem:[#allocation2 + $0x8] sm:$0xff] }
 0x1db   : > { %1130 = vmatprep.subr.bf16.mxu1 %v562_v20  ;;  %v616_v8 = vld [vmem:[#allocation2 + $0x10] sm:$0xff]  ;;  %v748_v9 = vld [vmem:[#allocation7 + $0x68] sm:$0xff]  ;;  %v747_v10 = vld [vmem:[#allocation7 + $0x60] sm:$0xff] }
 0x1dc   : > { %768 = vperm.xlu1 %1266, %v738_v62   ;;  %v750_v11 = vld [vmem:[#allocation7 + $0x78] sm:$0xff]  ;;  %v749_v12 = vld [vmem:[#allocation7 + $0x70] sm:$0xff]  ;;  %v618_v14 = vld [vmem:[#allocation2 + $0x20] sm:$0xff] }
 0x1dd   : > { %758 = vperm.xlu0 %1265, %v736_v63   ;;  %v617_v13 = vld [vmem:[#allocation2 + $0x18] sm:$0xff]  ;;  %v619_v15 = vld [vmem:[#allocation2 + $0x28] sm:$0xff]  ;;  %v620_v16 = vld [vmem:[#allocation2 + $0x30] sm:$0xff] }
 0x1de   : > { %1131 = vmatpush3.bf16.msra.mxu1 %v562_v20  ;;  %v621_v17 = vld [vmem:[#allocation2 + $0x38] sm:$0xff]  ;;  %v719_v30 = vld [vmem:[#allocation11] sm:$0xff]  ;;  %v720_v38 = vld [vmem:[#allocation11 + $0x8] sm:$0xff] }
 0x1df   : > { %1132 = vmatprep.subr.bf16.mxu1 %v563_v28  ;;  %v721_v27 = vld [vmem:[#allocation11 + $0x10] sm:$0xff]  ;;  %v722_v34 = vld [vmem:[#allocation11 + $0x18] sm:$0xff] }
 0x1e0   : > { %778 = vperm.xlu1 %1266, %v740_v26   ;;  %v725_v46 = vld [vmem:[#allocation11 + $0x30] sm:$0xff]  ;;  %v726_v52 = vld [vmem:[#allocation11 + $0x38] sm:$0xff] }
 0x1e1   : > { %773 = vperm.xlu0 %1265, %v739_v0   ;;  %v729_v26 = vld [vmem:[#allocation11 + $0x50] sm:$0xff] }
 0x1e2   : > { %1133 = vmatpush3.bf16.msra.mxu1 %v563_v28 }
 0x1e3   : > { %1134 = vmatprep.subr.bf16.mxu1 %v564_v35 }
 0x1e4   : > { %788 = vperm.xlu1 %1266, %v742_v1  }
 0x1e5   : > { %783 = vperm.xlu0 %1265, %v741_v2   ;;  %v727_v2 = vld [vmem:[#allocation11 + $0x40] sm:$0xff] }
 0x1e6   : > { %1135 = vmatpush3.bf16.msra.mxu1 %v564_v35 }
 0x1e7   : > { %1136 = vmatprep.subr.bf16.mxu1 %v565_v42 }
 0x1e8   : > { %798 = vperm.xlu1 %1266, %v744_v3  }
 0x1e9   : > { %793 = vperm.xlu0 %1265, %v743_v4  }
 0x1ea   : > { %1137 = vmatpush3.bf16.msra.mxu1 %v565_v42 }
 0x1eb   : > { %1138 = vmatprep.subr.bf16.mxu1 %v566_v49 }
 0x1ec   : > { %808 = vperm.xlu1 %1266, %v746_v5  }
 0x1ed   : > { %803 = vperm.xlu0 %1265, %v745_v6   ;;  %v730_v6 = vld [vmem:[#allocation11 + $0x58] sm:$0xff] }
 0x1ee   : > { %1139 = vmatpush3.bf16.msra.mxu1 %v566_v49  ;;  %v723_v49 = vld [vmem:[#allocation11 + $0x20] sm:$0xff] }
 0x1ef   : > { %1140 = vmatprep.subr.bf16.mxu1 %v567_v56 }
 0x1f0   : > { %818 = vperm.xlu1 %1266, %v748_v9  }
 0x1f1   : > { %813 = vperm.xlu0 %1265, %v747_v10   ;;  %v728_v10 = vld [vmem:[#allocation11 + $0x48] sm:$0xff] }
 0x1f2   : > { %1141 = vmatpush3.bf16.msra.mxu1 %v567_v56  ;;  %v724_v56 = vld [vmem:[#allocation11 + $0x28] sm:$0xff] }
 0x1f4   : > { %828 = vperm.xlu1 %1266, %v750_v11  }
 0x1f5   : > { %1143 = vmatmul.mubr.bf16.vlgmr.msra.gmra.mrb[0].mxu1 %v615_v7  ;;  %823 = vperm.xlu0 %1265, %v749_v12  }
 0x1f6   : > { %1146 = vmatprep.mubr.bf16.mxu1 %v616_v8 }
 0x1fd   : > { %1147 = vmatmul.mubr.bf16.gmra.mrb[4].mxu1 %v617_v13 }
 0x1fe   : > { %1150 = vmatprep.mubr.bf16.mxu1 %v618_v14 }
 0x205   : > { %1151 = vmatmul.mubr.bf16.gmra.mrb[8].mxu1 %v619_v15 }
 0x206   : > { %1154 = vmatprep.mubr.bf16.mxu1 %v620_v16 }
 0x20d   : > { %1155 = vmatmul.mubr.bf16.gmra.mrb[12].mxu1 %v621_v17 }
 0x257   : > { %v764_v19 = vpop.permute.xlu1 %763 }
 0x258   : > { %v754_v18 = vpop.permute.xlu0 %753 }
 0x25b   : > { %v769_v21 = vpop.permute.xlu1 %768 }
 0x25c   : > { %v759_v20 = vpop.permute.xlu0 %758 }
 0x25f   : > { %v779_v23 = vpop.permute.xlu1 %778 }
 0x260   : > { %v774_v22 = vpop.permute.xlu0 %773 }
 0x263   : > { %v789_v31 = vpop.permute.xlu1 %788 }
 0x264   : > { %v784_v24 = vpop.permute.xlu0 %783 }
 0x267   : > { %v799_v44 = vpop.permute.xlu1 %798 }
 0x268   : > { %v794_v42 = vpop.permute.xlu0 %793 }
 0x26b   : > { %v809_v61 = vpop.permute.xlu1 %808 }
 0x26c   : > { %v804_v57 = vpop.permute.xlu0 %803 }
 0x26f   : > { %v819_v11 = vpop.permute.xlu1 %818 }
 0x270   : > { %v814_v3 = vpop.permute.xlu0 %813 }
 0x274   : > { %v824_v16 = vpop.permute.xlu0 %823 }
 0x2c8   : > { %v1144_v25 = vpop.f32.mrb[0].mxu1 }
 0x2c9   : > { %v833_v28 = vmul.f32 %v1144_v25, %v764_v19  ;;  %v656_v29 = vpop.f32.mrb[1].mxu1  ;;  %v734_v25 = vld [vmem:[#allocation11 + $0x78] sm:$0xff] }
 0x2ca   : > { %v831_v32 = vmul.f32 %v754_v18, %v656_v29  ;;  %v1145_v33 = vpop.f32.mrb[2].mxu1  ;;  %v733_v18 = vld [vmem:[#allocation11 + $0x70] sm:$0xff] }
 0x2cb   : > { %v849_v35 = vadd.f32 %v833_v28, %v721_v27  ;;  %v834_v36 = vmul.f32 %v1145_v33, %v769_v21  ;;  %v659_v37 = vpop.f32.mrb[3].mxu1  ;;  %v731_v21 = vld [vmem:[#allocation11 + $0x60] sm:$0xff] }
 0x2cc   : > { %v847_v39 = vadd.f32 %v831_v32, %v719_v30  ;;  %v832_v40 = vmul.f32 %v759_v20, %v659_v37  ;;  %v732_v30 = vld [vmem:[#allocation11 + $0x68] sm:$0xff] }
 0x2cd   : > { %865 = vst [vmem:[#allocation11 + $0x10] sm:$0xff] %v849_v35  ;;  %v850_v41 = vadd.f32 %v834_v36, %v722_v34 }
 0x2ce   : > { %863 = vst [vmem:[#allocation11] sm:$0xff] %v847_v39  ;;  %v848_v43 = vadd.f32 %v832_v40, %v720_v38 }
 0x2cf   : > { %866 = vst [vmem:[#allocation11 + $0x18] sm:$0xff] %v850_v41 }
 0x2d0   : > { %864 = vst [vmem:[#allocation11 + $0x8] sm:$0xff] %v848_v43  ;;  %v1148_v45 = vpop.f32.mrb[4].mxu1 }
 0x2d1   : > { %v837_v47 = vmul.f32 %v1148_v45, %v784_v24  ;;  %v672_v48 = vpop.f32.mrb[5].mxu1 }
 0x2d2   : > { %v835_v50 = vmul.f32 %v774_v22, %v672_v48  ;;  %v1149_v51 = vpop.f32.mrb[6].mxu1  ;;  %v829_v22 = vpop.permute.xlu1 %828 }
 0x2d3   : > { %v853_v53 = vadd.f32 %v837_v47, %v725_v46  ;;  %v838_v54 = vmul.f32 %v1149_v51, %v789_v31  ;;  %v675_v55 = vpop.f32.mrb[7].mxu1 }
 0x2d4   : > { %v851_v58 = vadd.f32 %v835_v50, %v723_v49  ;;  %v836_v59 = vmul.f32 %v779_v23, %v675_v55  ;;  %v885_v37 = vld [vmem:[#allocation11 + $0x10] sm:$0xff] (!%p1064_p10) }
 0x2d5   : > { %869 = vst [vmem:[#allocation11 + $0x30] sm:$0xff] %v853_v53  ;;  %v854_v60 = vadd.f32 %v838_v54, %v726_v52  ;;  %v883_v35 = vld [vmem:[#allocation11] sm:$0xff] (!%p1064_p10)  ;;  %v901_v40 = vmax.f32 (!%p1064_p10), %v885_v37, 0.0 }
 0x2d6   : > { %867 = vst [vmem:[#allocation11 + $0x20] sm:$0xff] %v851_v58  ;;  %v852_v62 = vadd.f32 %v836_v59, %v724_v56  ;;  %v899_v38 = vmax.f32 (!%p1064_p10), %v883_v35, 0.0  ;;  %v886_v41 = vld [vmem:[#allocation11 + $0x18] sm:$0xff] (!%p1064_p10) }
 0x2d7   : > { %870 = vst [vmem:[#allocation11 + $0x38] sm:$0xff] %v854_v60  ;;  %v884_v36 = vld [vmem:[#allocation11 + $0x8] sm:$0xff] (!%p1064_p10)  ;;  %917 = vst [vmem:[#allocation11 + $0x10] sm:$0xff] (!%p1064_p10), %v901_v40 }
 0x2d8   : > { %868 = vst [vmem:[#allocation11 + $0x28] sm:$0xff] %v852_v62  ;;  %v1152_v63 = vpop.f32.mrb[8].mxu1  ;;  %v900_v39 = vmax.f32 (!%p1064_p10), %v884_v36, 0.0  ;;  %915 = vst [vmem:[#allocation11] sm:$0xff] (!%p1064_p10), %v899_v38 }
 0x2d9   : > { %v841_v0 = vmul.f32 %v1152_v63, %v804_v57  ;;  %v688_v1 = vpop.f32.mrb[9].mxu1 }
 0x2da   : > { %v839_v4 = vmul.f32 %v794_v42, %v688_v1  ;;  %v1153_v5 = vpop.f32.mrb[10].mxu1  ;;  %916 = vst [vmem:[#allocation11 + $0x8] sm:$0xff] (!%p1064_p10), %v900_v39 }
 0x2db   : > { %v857_v7 = vadd.f32 %v841_v0, %v729_v26  ;;  %v842_v8 = vmul.f32 %v1153_v5, %v809_v61  ;;  %v691_v9 = vpop.f32.mrb[11].mxu1 }
 0x2dc   : > { %v855_v12 = vadd.f32 %v839_v4, %v727_v2  ;;  %v840_v13 = vmul.f32 %v799_v44, %v691_v9  ;;  %v902_v44 = vmax.f32 (!%p1064_p10), %v886_v41, 0.0  ;;  %v889_v47 = vld [vmem:[#allocation11 + $0x30] sm:$0xff] (!%p1064_p10) }
 0x2dd   : > { %873 = vst [vmem:[#allocation11 + $0x50] sm:$0xff] %v857_v7  ;;  %v858_v14 = vadd.f32 %v842_v8, %v730_v6  ;;  %v887_v42 = vld [vmem:[#allocation11 + $0x20] sm:$0xff] (!%p1064_p10)  ;;  %v905_v50 = vmax.f32 (!%p1064_p10), %v889_v47, 0.0 }
 0x2de   : > { %871 = vst [vmem:[#allocation11 + $0x40] sm:$0xff] %v855_v12  ;;  %v856_v15 = vadd.f32 %v840_v13, %v728_v10  ;;  %v903_v45 = vmax.f32 (!%p1064_p10), %v887_v42, 0.0  ;;  %v890_v48 = vld [vmem:[#allocation11 + $0x38] sm:$0xff] (!%p1064_p10)  ;;  %918 = vst [vmem:[#allocation11 + $0x18] sm:$0xff] (!%p1064_p10), %v902_v44 }
 0x2df   : > { %874 = vst [vmem:[#allocation11 + $0x58] sm:$0xff] %v858_v14  ;;  %v888_v43 = vld [vmem:[#allocation11 + $0x28] sm:$0xff] (!%p1064_p10)  ;;  %v906_v51 = vmax.f32 (!%p1064_p10), %v890_v48, 0.0  ;;  %921 = vst [vmem:[#allocation11 + $0x30] sm:$0xff] (!%p1064_p10), %v905_v50 }
 0x2e0   : > { %872 = vst [vmem:[#allocation11 + $0x48] sm:$0xff] %v856_v15  ;;  %v1156_v17 = vpop.f32.mrb[12].mxu1  ;;  %v904_v46 = vmax.f32 (!%p1064_p10), %v888_v43, 0.0  ;;  %919 = vst [vmem:[#allocation11 + $0x20] sm:$0xff] (!%p1064_p10), %v903_v45 }
 0x2e1   : > { %v845_v19 = vmul.f32 %v1156_v17, %v824_v16  ;;  %v704_v20 = vpop.f32.mrb[13].mxu1  ;;  %922 = vst [vmem:[#allocation11 + $0x38] sm:$0xff] (!%p1064_p10), %v906_v51 }
 0x2e2   : > { %v843_v23 = vmul.f32 %v814_v3, %v704_v20  ;;  %v1157_v24 = vpop.f32.mrb[14].mxu1  ;;  %882 = sbr.rel (%p1064_p10) target bundleno = 755 (0x2f3), region = 68  ;;  %920 = vst [vmem:[#allocation11 + $0x28] sm:$0xff] (!%p1064_p10), %v904_v46 }
 0x2e3   : > { %v861_v27 = vadd.f32 %v845_v19, %v733_v18  ;;  %v846_v28 = vmul.f32 %v1157_v24, %v829_v22  ;;  %v707_v29 = vpop.f32.mrb[15].mxu1 }
 0x2e4   : > { %v859_v31 = vadd.f32 %v843_v23, %v731_v21  ;;  %v844_v32 = vmul.f32 %v819_v11, %v707_v29  ;;  %v893_v54 = vld [vmem:[#allocation11 + $0x50] sm:$0xff] (!%p1064_p10) }
 0x2e5   : > { %877 = vst [vmem:[#allocation11 + $0x70] sm:$0xff] %v861_v27  ;;  %v862_v33 = vadd.f32 %v846_v28, %v734_v25  ;;  %v891_v49 = vld [vmem:[#allocation11 + $0x40] sm:$0xff] (!%p1064_p10)  ;;  %v909_v57 = vmax.f32 (!%p1064_p10), %v893_v54, 0.0 }
 0x2e6   : > { %875 = vst [vmem:[#allocation11 + $0x60] sm:$0xff] %v859_v31  ;;  %v860_v34 = vadd.f32 %v844_v32, %v732_v30  ;;  %v907_v52 = vmax.f32 (!%p1064_p10), %v891_v49, 0.0  ;;  %v894_v55 = vld [vmem:[#allocation11 + $0x58] sm:$0xff] (!%p1064_p10) }
 0x2e7   : > { %878 = vst [vmem:[#allocation11 + $0x78] sm:$0xff] %v862_v33  ;;  %v892_v53 = vld [vmem:[#allocation11 + $0x48] sm:$0xff] (!%p1064_p10)  ;;  %v910_v58 = vmax.f32 (!%p1064_p10), %v894_v55, 0.0  ;;  %925 = vst [vmem:[#allocation11 + $0x50] sm:$0xff] (!%p1064_p10), %v909_v57 }
 0x2e8   : > { %876 = vst [vmem:[#allocation11 + $0x68] sm:$0xff] %v860_v34  ;;  %v908_v56 = vmax.f32 (!%p1064_p10), %v892_v53, 0.0  ;;  %923 = vst [vmem:[#allocation11 + $0x40] sm:$0xff] (!%p1064_p10), %v907_v52 }
 0x2e9   : > { %926 = vst [vmem:[#allocation11 + $0x58] sm:$0xff] %v910_v58 }
 0x2ea   : > { %924 = vst [vmem:[#allocation11 + $0x48] sm:$0xff] %v908_v56 }
 0x2ec   : > { %v897_v61 = vld [vmem:[#allocation11 + $0x70] sm:$0xff] }
 0x2ed   : > { %v895_v59 = vld [vmem:[#allocation11 + $0x60] sm:$0xff]  ;;  %v913_v26 = vmax.f32 %v897_v61, 0.0 }
 0x2ee   : > { %v911_v62 = vmax.f32 %v895_v59, 0.0  ;;  %v898_v0 = vld [vmem:[#allocation11 + $0x78] sm:$0xff] }
 0x2ef   : > { %v896_v60 = vld [vmem:[#allocation11 + $0x68] sm:$0xff]  ;;  %v914_v1 = vmax.f32 %v898_v0, 0.0  ;;  %929 = vst [vmem:[#allocation11 + $0x70] sm:$0xff] %v913_v26 }
 0x2f0   : > { %v912_v63 = vmax.f32 %v896_v60, 0.0  ;;  %927 = vst [vmem:[#allocation11 + $0x60] sm:$0xff] %v911_v62 }
 0x2f1   : > { %930 = vst [vmem:[#allocation11 + $0x78] sm:$0xff] %v914_v1 }
 0x2f2   : > { %928 = vst [vmem:[#allocation11 + $0x68] sm:$0xff] %v912_v63 }
 0x2f3 PF: > { %p1196_p1 = scmp.eq.s32.totalorder %s1545_s22, 2  ;;  %s1493_s24 = smov [#allocation11]  }
 0x2f4   : > { %s937_s16 = sshll.u32 %s1493_s24, 4  ;;  %s938_s16 = int_to_ptr.vmem [resolvable:$true] %s937_s16 }
 0x2f5   : > { %s1405_s8 = scalar_lea.vmem %s938_s16, 2048  ;;  %p1412_p0 = scmp.lt.s32.totalorder %s938_s16, %s938_s16 }
 0x2f6   : > { %p1406_p9 = scmp.ne.s32.totalorder %s938_s16, %s1405_s8  ;;  %p1413_p8 = scmp.lt.s32.totalorder %s1405_s8, %s1405_s8 }
 0x2f8   : > { %p1407_p3 = pnand %p1406_p9, %p1196_p1  ;;  %p1414_p2 = por %p1413_p8, %p1412_p0 }
 0x2fa   : > { %p1408_p6 = pneg %p1407_p3 }
 0x2fc   : > { %p1415_p4 = pnand %p1414_p2, %p1408_p6 }
 0x2fe   : > { %1418 = shalt.err (!%p1415_p4)
}
 0x2ff   : > { %s1419_s29 = scalar_lea.hbm %s1832_s5, 2048 }
 0x300   : > { %p1420_p11 = scmp.ne.s32.totalorder %s1832_s5, %s1419_s29  ;;  %p1425_p13 = scmp.lt.u32.totalorder %s1419_s29, %s1832_s5 }
 0x302   : > { %p1421_p12 = pnand %p1420_p11, %p1196_p1 }
 0x304   : > { %p1422_p7 = pneg %p1421_p12 }
 0x306   : > { %p1427_p5 = pnand %p1425_p13, %p1422_p7 }
 0x308   : > { %1430 = shalt.err (!%p1427_p5)
}
 0x309   : > { %s1494_s28 = smov 128   ;;  %s1495_s12 = smov 8  }
 0x30a   : > { %1173 = dma.vmem_to_hbm [thread:$0]  (%p1196_p1), %s938_s16, 2048, %s1832_s5, [#allocation6], %s1494_s28, %s1494_s28, %s1495_s12  }
 0x30b   : > { %1464 = dma.done.wait (%p1196_p1), [#allocation6], 2048  }
 0x30c   : > { %1466 = vsyncadd (%p1196_p1), [#allocation6], 4294965248 }
 0x30d PF: > { %p15_p10 = scmp.ge.s32.totalorder %s1548_s23, 5   ;;  %s1860_s18 = smov %s1473_s19 }
 0x30e   : > { %s1861_s19 = smov %s1477_s20  ;;  %s1862_s20 = smov %s1558_s26 }
 0x30f   : > { %s1863_s21 = smov %s1548_s23  ;;  %17 = sbr.rel (!%p15_p10) target bundleno = 4 (0x4), region = 107 }
 0x316   :  { %953 = vsyncpa [#allocation5], 1 }
 0x317   :  { %955 = vsyncpa [#allocation5 + $0x1], 1 }
 0x318   :  { %956 = vsyncpa [#allocation8], 1 }
 0x319   :  { %957 = vsyncpa [#allocation6], 1 }
 0x31a   :  { %959 = vsyncpa [#allocation6 + $0x1], 1 }
 0x31b   :  { %960 = vsyncmov [#allocation3] }
 0x31e   :  { %s961_s22 = vpop.sfrf %960 }
 0x31f   :  { %p1069_p1 = scmp.ne.s32.totalorder %s961_s22, 0 }
 0x321   :  { %965 = shalt.err (%p1069_p1)  }

</bundles_post_ra>
